<compile_context>
chip_gen: v7x
topology: tpu7x:2x2x1
jax: 0.10.0
libtpu: 0.0.40
codegen_flags: <defaults>
</compile_context>

<pallas_src>
import jax
import jax.numpy as jnp
from jax.experimental import pallas as pl
from jax.experimental.pallas import tpu as pltpu


def _mlp_kernel(xT_ref, w_inT_ref, b_in_ref, w_hT_ref, b_h_ref,
                w_outT_ref, b_out_ref, oT_ref):
    """Full MLP forward for one batch tile; activations are [features, TB]."""
    xT = xT_ref[...].astype(jnp.float32)                   # [in, TB]
    w_inT = w_inT_ref[...]                                  # [H, in]
    in_size, tb = xT.shape
    hidden = w_inT.shape[0]

    # ---- input projection (no activation) --------------------------------
    if in_size < 8:
        # K is tiny (2 for PINN coords): a couple of VPU FMAs beat an almost
        # empty MXU tile and shorten the path into the first tanh.
        h = jnp.zeros((hidden, tb), jnp.float32)
        for k in range(in_size):
            h = h + w_inT[:, k:k + 1] * xT[k:k + 1, :]
    else:
        h = jnp.dot(w_inT, xT, preferred_element_type=jnp.float32)
    h = h + b_in_ref[...]                                   # [H, 1] broadcast

    # ---- hidden layers: h = tanh(W_l @ h + b_l) ---------------------------
    n_hidden = w_hT_ref.shape[0]                            # static
    if n_hidden <= 8:
        # Small fixed depth: full unroll (no live-range blow-up at this size).
        for l in range(n_hidden):
            z = jnp.dot(w_hT_ref[l], h, preferred_element_type=jnp.float32)
            h = jnp.tanh(z + b_h_ref[l])
    else:
        # Deep nets: bound live ranges with a real loop (dynamic ref index).
        def body(l, hh):
            z = jnp.dot(w_hT_ref[l], hh, preferred_element_type=jnp.float32)
            return jnp.tanh(z + b_h_ref[l])
        h = jax.lax.fori_loop(0, n_hidden, body, h)

    # ---- output projection (no activation) --------------------------------
    y = jnp.dot(w_outT_ref[...], h, preferred_element_type=jnp.float32)
    y = y + b_out_ref[...]                                  # [out, 1] broadcast
    oT_ref[...] = y.astype(oT_ref.dtype)                    # lane-dense store


def _round_up(n, m):
    return ((n + m - 1) // m) * m


def mlp_forward(x, params, *, batch_tile=1024):
    """x: [B, input_size] float32.  Returns [B, output_size]."""
    w_in, b_in = params["w_in"], params["b_in"]        # [in,H], [H]
    w_h, b_h = params["w_h"], params["b_h"]            # [L,H,H], [L,H]
    w_out, b_out = params["w_out"], params["b_out"]    # [H,out], [out]

    B, in_size = x.shape
    H = w_in.shape[1]
    L = w_h.shape[0]
    out_size = w_out.shape[1]

    # Lane-dense tiles: batch_tile is a multiple of 128, no larger than the
    # padded batch, and small enough to keep the grid length >= 2 when the
    # batch allows it (so both v7x TensorCores get work).
    batch_tile = max(128, min(_round_up(batch_tile, 128), _round_up(B, 128)))
    if B > 128 and pl.cdiv(B, batch_tile) < 2:
        batch_tile = _round_up(pl.cdiv(B, 2), 128)
    B_pad = _round_up(B, batch_tile)
    grid = (B_pad // batch_tile,)

    # Transposed operands (trivial wrapper-side XLA ops): batch on the lane
    # axis for activations, weights pre-transposed so the kernel computes
    # W^T @ h directly.
    if B_pad != B:
        x = jnp.pad(x, ((0, B_pad - B), (0, 0)))
    xT = x.T                                            # [in, B_pad]
    w_inT = w_in.T                                      # [H, in]
    w_hT = jnp.swapaxes(w_h, 1, 2)                      # [L, H, H]  (= W_l^T)
    w_outT = w_out.T                                    # [out, H]
    b_in_c = b_in.reshape(H, 1)
    b_h_c = b_h.reshape(L, H, 1)
    b_out_c = b_out.reshape(out_size, 1)

    yT = pl.pallas_call(
        _mlp_kernel,
        out_shape=jax.ShapeDtypeStruct((out_size, B_pad), x.dtype),
        grid_spec=pltpu.PrefetchScalarGridSpec(
            num_scalar_prefetch=0,
            grid=grid,
            in_specs=[
                pl.BlockSpec((in_size, batch_tile), lambda i: (0, i)),   # xT
                # Weights/biases: full-array blocks with a constant
                # index_map -> resident in VMEM across the whole grid.
                # (pipeline_mode=pl.Buffered(1) would also drop their
                # second buffer, but at H=32 that saves only ~12 KiB.)
                pl.BlockSpec((H, in_size), lambda i: (0, 0)),            # w_inT
                pl.BlockSpec((H, 1), lambda i: (0, 0)),                  # b_in
                pl.BlockSpec((L, H, H), lambda i: (0, 0, 0)),            # w_hT
                pl.BlockSpec((L, H, 1), lambda i: (0, 0, 0)),            # b_h
                pl.BlockSpec((out_size, H), lambda i: (0, 0)),           # w_outT
                pl.BlockSpec((out_size, 1), lambda i: (0, 0)),           # b_out
            ],
            out_specs=pl.BlockSpec((out_size, batch_tile), lambda i: (0, i)),
        ),
        compiler_params=pltpu.CompilerParams(
            dimension_semantics=("parallel",)),
    )(xT, w_inT, b_in_c, w_hT, b_h_c, w_outT, b_out_c)

    return yT[:, :B].T                                  # back to [B, out]


def init_params(key, input_size, output_size, hidden_layers, hidden_units):
    """Deterministic init mimicking nn.Linear's U(-1/sqrt(fan_in), 1/sqrt(fan_in))."""
    def linear(k, fan_in, fan_out):
        kw, kb = jax.random.split(k)
        bound = 1.0 / jnp.sqrt(fan_in)
        w = jax.random.uniform(kw, (fan_in, fan_out), jnp.float32, -bound, bound)
        b = jax.random.uniform(kb, (fan_out,), jnp.float32, -bound, bound)
        return w, b

    keys = jax.random.split(key, hidden_layers + 2)
    w_in, b_in = linear(keys[0], input_size, hidden_units)
    hs = [linear(keys[1 + l], hidden_units, hidden_units)
          for l in range(hidden_layers)]
    w_h = jnp.stack([w for w, _ in hs], axis=0)          # [L, H, H]
    b_h = jnp.stack([b for _, b in hs], axis=0)          # [L, H]
    w_out, b_out = linear(keys[-1], hidden_units, output_size)
    return {"w_in": w_in, "b_in": b_in, "w_h": w_h, "b_h": b_h,
            "w_out": w_out, "b_out": b_out}


def mlp_reference(x, params):
    """Pure-JAX reference for correctness checking."""
    h = x @ params["w_in"] + params["b_in"][None, :]
    for l in range(params["w_h"].shape[0]):
        h = jnp.tanh(h @ params["w_h"][l] + params["b_h"][l][None, :])
    return h @ params["w_out"] + params["b_out"][None, :]


if __name__ == "__main__":
    # PINN-style shapes: 2-D input coords -> scalar output, small tanh MLP.
    input_size, output_size = 2, 1
    hidden_layers, hidden_units = 3, 32
    batch = 500   # not a multiple of the tile: exercises padding; the wrapper
                  # pads to 512 and uses batch_tile=256 -> grid=(2,)

    key = jax.random.PRNGKey(0)
    k_params, k_x = jax.random.split(key)
    params = init_params(k_params, input_size, output_size,
                         hidden_layers, hidden_units)
    x = jax.random.normal(k_x, (batch, input_size), jnp.float32)

    y = mlp_forward(x, params)
    y = jax.block_until_ready(y)

    y_ref = mlp_reference(x, params)
    assert y.shape == (batch, output_size)
    max_err = jnp.max(jnp.abs(y - y_ref))
    assert jnp.allclose(y, y_ref, atol=1e-4, rtol=1e-4), f"mismatch: {max_err}"

    print("KERNEL_OK")
</pallas_src>

<mosaic_0001>
module attributes {stable_mosaic.version = 11 : i64} {
  func.func @_mlp_kernel(%arg0: i32, %arg1: memref<2x256xf32, #tpu.memory_space<vmem>>, %arg2: memref<32x2xf32, #tpu.memory_space<vmem>>, %arg3: memref<32x1xf32, #tpu.memory_space<vmem>>, %arg4: memref<3x32x32xf32, #tpu.memory_space<vmem>>, %arg5: memref<3x32x1xf32, #tpu.memory_space<vmem>>, %arg6: memref<1x32xf32, #tpu.memory_space<vmem>>, %arg7: memref<1x1xf32, #tpu.memory_space<vmem>>, %arg8: memref<1x256xf32, #tpu.memory_space<vmem>>) attributes {dimension_semantics = [#tpu.dimension_semantics<parallel>], iteration_bounds = array<i64: 2>, scalar_prefetch = 0 : i64, scratch_operands = 0 : i64, tpu.core_type = #tpu.core_type<tc>, window_params = [{transform_indices = @transform_0, window_bounds = array<i64: 2, 256>}, {pipeline_mode = #tpu.pipeline_mode<synchronous>, transform_indices = @transform_1, window_bounds = array<i64: 32, 2>}, {pipeline_mode = #tpu.pipeline_mode<synchronous>, transform_indices = @transform_2, window_bounds = array<i64: 32, 1>}, {pipeline_mode = #tpu.pipeline_mode<synchronous>, transform_indices = @transform_3, window_bounds = array<i64: 3, 32, 32>}, {pipeline_mode = #tpu.pipeline_mode<synchronous>, transform_indices = @transform_4, window_bounds = array<i64: 3, 32, 1>}, {pipeline_mode = #tpu.pipeline_mode<synchronous>, transform_indices = @transform_5, window_bounds = array<i64: 1, 32>}, {pipeline_mode = #tpu.pipeline_mode<synchronous>, transform_indices = @transform_6, window_bounds = array<i64: 1, 1>}, {transform_indices = @transform_7, window_bounds = array<i64: 1, 256>}]} {
    %c0 = arith.constant 0 : index
    %c0_0 = arith.constant 0 : index
    %0 = vector.load %arg1[%c0, %c0_0] : memref<2x256xf32, #tpu.memory_space<vmem>>, vector<2x256xf32>
    %c0_1 = arith.constant 0 : index
    %c0_2 = arith.constant 0 : index
    %1 = vector.load %arg2[%c0_1, %c0_2] : memref<32x2xf32, #tpu.memory_space<vmem>>, vector<32x2xf32>
    %cst = arith.constant 0.000000e+00 : f32
    %2 = vector.broadcast %cst : f32 to vector<32x256xf32>
    %3 = vector.extract_strided_slice %1 {offsets = [0, 0], sizes = [32, 1], strides = [1, 1]} : vector<32x2xf32> to vector<32x1xf32>
    %4 = vector.extract_strided_slice %0 {offsets = [0, 0], sizes = [1, 256], strides = [1, 1]} : vector<2x256xf32> to vector<1x256xf32>
    %5 = vector.broadcast %3 : vector<32x1xf32> to vector<32x256xf32>
    %6 = vector.broadcast %4 : vector<1x256xf32> to vector<32x256xf32>
    %7 = arith.mulf %5, %6 : vector<32x256xf32>
    %8 = arith.addf %2, %7 : vector<32x256xf32>
    %9 = vector.extract_strided_slice %1 {offsets = [0, 1], sizes = [32, 1], strides = [1, 1]} : vector<32x2xf32> to vector<32x1xf32>
    %10 = vector.extract_strided_slice %0 {offsets = [1, 0], sizes = [1, 256], strides = [1, 1]} : vector<2x256xf32> to vector<1x256xf32>
    %11 = vector.broadcast %9 : vector<32x1xf32> to vector<32x256xf32>
    %12 = vector.broadcast %10 : vector<1x256xf32> to vector<32x256xf32>
    %13 = arith.mulf %11, %12 : vector<32x256xf32>
    %14 = arith.addf %8, %13 : vector<32x256xf32>
    %c0_3 = arith.constant 0 : index
    %c0_4 = arith.constant 0 : index
    %15 = vector.load %arg3[%c0_3, %c0_4] : memref<32x1xf32, #tpu.memory_space<vmem>>, vector<32x1xf32>
    %16 = vector.broadcast %15 : vector<32x1xf32> to vector<32x256xf32>
    %17 = arith.addf %14, %16 : vector<32x256xf32>
    %c0_5 = arith.constant 0 : index
    %c0_6 = arith.constant 0 : index
    %c0_7 = arith.constant 0 : index
    %18 = vector.load %arg4[%c0_5, %c0_6, %c0_7] : memref<3x32x32xf32, #tpu.memory_space<vmem>>, vector<1x32x32xf32>
    %19 = vector.shape_cast %18 : vector<1x32x32xf32> to vector<32x32xf32>
    %cst_8 = arith.constant dense<0.000000e+00> : vector<32x256xf32>
    %20 = tpu.matmul %19, %17, %cst_8 {dimension_numbers = #tpu.dot_dimension_numbers<[1], [0], [0], [1], [0, 0, 1, 1], [], []>} : vector<32x32xf32>, vector<32x256xf32>, vector<32x256xf32> -> vector<32x256xf32>
    %c0_9 = arith.constant 0 : index
    %c0_10 = arith.constant 0 : index
    %c0_11 = arith.constant 0 : index
    %21 = vector.load %arg5[%c0_9, %c0_10, %c0_11] : memref<3x32x1xf32, #tpu.memory_space<vmem>>, vector<1x32x1xf32>
    %22 = vector.shape_cast %21 : vector<1x32x1xf32> to vector<32x1xf32>
    %23 = vector.broadcast %22 : vector<32x1xf32> to vector<32x256xf32>
    %24 = arith.addf %20, %23 : vector<32x256xf32>
    %25 = math.tanh %24 : vector<32x256xf32>
    %c1 = arith.constant 1 : index
    %c0_12 = arith.constant 0 : index
    %c0_13 = arith.constant 0 : index
    %26 = vector.load %arg4[%c1, %c0_12, %c0_13] : memref<3x32x32xf32, #tpu.memory_space<vmem>>, vector<1x32x32xf32>
    %27 = vector.shape_cast %26 : vector<1x32x32xf32> to vector<32x32xf32>
    %cst_14 = arith.constant dense<0.000000e+00> : vector<32x256xf32>
    %28 = tpu.matmul %27, %25, %cst_14 {dimension_numbers = #tpu.dot_dimension_numbers<[1], [0], [0], [1], [0, 0, 1, 1], [], []>} : vector<32x32xf32>, vector<32x256xf32>, vector<32x256xf32> -> vector<32x256xf32>
    %c1_15 = arith.constant 1 : index
    %c0_16 = arith.constant 0 : index
    %c0_17 = arith.constant 0 : index
    %29 = vector.load %arg5[%c1_15, %c0_16, %c0_17] : memref<3x32x1xf32, #tpu.memory_space<vmem>>, vector<1x32x1xf32>
    %30 = vector.shape_cast %29 : vector<1x32x1xf32> to vector<32x1xf32>
    %31 = vector.broadcast %30 : vector<32x1xf32> to vector<32x256xf32>
    %32 = arith.addf %28, %31 : vector<32x256xf32>
    %33 = math.tanh %32 : vector<32x256xf32>
    %c2 = arith.constant 2 : index
    %c0_18 = arith.constant 0 : index
    %c0_19 = arith.constant 0 : index
    %34 = vector.load %arg4[%c2, %c0_18, %c0_19] : memref<3x32x32xf32, #tpu.memory_space<vmem>>, vector<1x32x32xf32>
    %35 = vector.shape_cast %34 : vector<1x32x32xf32> to vector<32x32xf32>
    %cst_20 = arith.constant dense<0.000000e+00> : vector<32x256xf32>
    %36 = tpu.matmul %35, %33, %cst_20 {dimension_numbers = #tpu.dot_dimension_numbers<[1], [0], [0], [1], [0, 0, 1, 1], [], []>} : vector<32x32xf32>, vector<32x256xf32>, vector<32x256xf32> -> vector<32x256xf32>
    %c2_21 = arith.constant 2 : index
    %c0_22 = arith.constant 0 : index
    %c0_23 = arith.constant 0 : index
    %37 = vector.load %arg5[%c2_21, %c0_22, %c0_23] : memref<3x32x1xf32, #tpu.memory_space<vmem>>, vector<1x32x1xf32>
    %38 = vector.shape_cast %37 : vector<1x32x1xf32> to vector<32x1xf32>
    %39 = vector.broadcast %38 : vector<32x1xf32> to vector<32x256xf32>
    %40 = arith.addf %36, %39 : vector<32x256xf32>
    %41 = math.tanh %40 : vector<32x256xf32>
    %c0_24 = arith.constant 0 : index
    %c0_25 = arith.constant 0 : index
    %42 = vector.load %arg6[%c0_24, %c0_25] : memref<1x32xf32, #tpu.memory_space<vmem>>, vector<1x32xf32>
    %cst_26 = arith.constant dense<0.000000e+00> : vector<1x256xf32>
    %43 = tpu.matmul %42, %41, %cst_26 {dimension_numbers = #tpu.dot_dimension_numbers<[1], [0], [0], [1], [0, 0, 1, 1], [], []>} : vector<1x32xf32>, vector<32x256xf32>, vector<1x256xf32> -> vector<1x256xf32>
    %c0_27 = arith.constant 0 : index
    %c0_28 = arith.constant 0 : index
    %44 = vector.load %arg7[%c0_27, %c0_28] : memref<1x1xf32, #tpu.memory_space<vmem>>, vector<1x1xf32>
    %45 = vector.broadcast %44 : vector<1x1xf32> to vector<1x256xf32>
    %46 = arith.addf %43, %45 : vector<1x256xf32>
    %c0_29 = arith.constant 0 : index
    %c0_30 = arith.constant 0 : index
    %47 = vector.load %arg8[%c0_29, %c0_30] : memref<1x256xf32, #tpu.memory_space<vmem>>, vector<1x256xf32>
    tpu.vector_store %arg8[%c0_29, %c0_30], %46 {strides = array<i32>} : memref<1x256xf32, #tpu.memory_space<vmem>>, vector<1x256xf32>,
    return
  }
  func.func @transform_0(%arg0: i32) -> (i32, i32) {
    %c0_i32 = arith.constant 0 : i32
    %c0_i32_0 = arith.constant 0 : i32
    return %c0_i32, %arg0 : i32, i32
  }
  func.func @transform_1(%arg0: i32) -> (i32, i32) {
    %c0_i32 = arith.constant 0 : i32
    %c0_i32_0 = arith.constant 0 : i32
    %c0_i32_1 = arith.constant 0 : i32
    return %c0_i32, %c0_i32_0 : i32, i32
  }
  func.func @transform_2(%arg0: i32) -> (i32, i32) {
    %c0_i32 = arith.constant 0 : i32
    %c0_i32_0 = arith.constant 0 : i32
    %c0_i32_1 = arith.constant 0 : i32
    return %c0_i32, %c0_i32_0 : i32, i32
  }
  func.func @transform_3(%arg0: i32) -> (i32, i32, i32) {
    %c0_i32 = arith.constant 0 : i32
    %c0_i32_0 = arith.constant 0 : i32
    %c0_i32_1 = arith.constant 0 : i32
    %c0_i32_2 = arith.constant 0 : i32
    return %c0_i32, %c0_i32_0, %c0_i32_1 : i32, i32, i32
  }
  func.func @transform_4(%arg0: i32) -> (i32, i32, i32) {
    %c0_i32 = arith.constant 0 : i32
    %c0_i32_0 = arith.constant 0 : i32
    %c0_i32_1 = arith.constant 0 : i32
    %c0_i32_2 = arith.constant 0 : i32
    return %c0_i32, %c0_i32_0, %c0_i32_1 : i32, i32, i32
  }
  func.func @transform_5(%arg0: i32) -> (i32, i32) {
    %c0_i32 = arith.constant 0 : i32
    %c0_i32_0 = arith.constant 0 : i32
    %c0_i32_1 = arith.constant 0 : i32
    return %c0_i32, %c0_i32_0 : i32, i32
  }
  func.func @transform_6(%arg0: i32) -> (i32, i32) {
    %c0_i32 = arith.constant 0 : i32
    %c0_i32_0 = arith.constant 0 : i32
    %c0_i32_1 = arith.constant 0 : i32
    return %c0_i32, %c0_i32_0 : i32, i32
  }
  func.func @transform_7(%arg0: i32) -> (i32, i32) {
    %c0_i32 = arith.constant 0 : i32
    %c0_i32_0 = arith.constant 0 : i32
    return %c0_i32, %arg0 : i32, i32
  }
}

</mosaic_0001>

<bundles_post_ra>
// kernel: tpu_custom_call.1
= control target key start
LH: loop header
LB: loop body
LE: loop exit
PB: predicated region body
PF: predicated region fallthrough
CT: control target
= control target key end

     0   :  { %s1548_s0 = inlined_call_operand.vmem [shape: f32[2,512], index: 0, kind: input, shape index: {}]   ;;  %s1549_s1 = inlined_call_operand.vmem [shape: f32[32,2], index: 1, kind: input, shape index: {}]   ;;  %s1550_s2 = inlined_call_operand.vmem [shape: f32[32,1], index: 2, kind: input, shape index: {}]   ;;  %s1551_s3 = inlined_call_operand.vmem [shape: f32[3,32,32], index: 3, kind: input, shape index: {}]   ;;  %s1552_s4 = inlined_call_operand.vmem [shape: f32[3,32,1], index: 4, kind: input, shape index: {}]   ;;  %s1553_s5 = inlined_call_operand.vmem [shape: f32[1,32], index: 5, kind: input, shape index: {}]   ;;  %s1554_s6 = inlined_call_operand.<no memory space> [shape: f32[1,1], index: 6, kind: input, shape index: {}]   ;;  %s1555_s7 = inlined_call_operand.hbm [shape: f32[1,512], index: 7, kind: output, shape index: {}]  }
   0x1   :  { %v12_v0 = vstv %s1554_s6 }
   0x2   :  { %13 = vst [vmem:[#allocation2] sm:$0x1] %v12_v0 }
   0x3   :  { %14 = vsyncpa [#allocation4], 0 }
   0x4   :  { %16 = vsyncpa [#allocation4 + $0x1], 0  ;;  %s1309_s26 = smov 0   ;;  %s1311_s27 = smov 0  }
   0x5   :  { %s1313_s28 = smov 0   ;;  %s1315_s29 = smov 0  }
   0x6 LB: > { %s1330_s6 = sadd.s32 4294967295, %s1259_s29   ;;  %s1022_s30 = sadd.s32 4294967294, %s1259_s29   ;;  %s1259_s29 = sphi %s1315_s29, %s1561_s29   ;;  %s1255_s28 = sphi %s1313_s28, %s1560_s28   ;;  %s1251_s27 = sphi %s1311_s27, %s1559_s27   ;;  %s1247_s26 = sphi %s1309_s26, %s1558_s26  }
   0x7   : > { %s1334_s8 = sadd.s32 1, %s1259_s29   ;;  %s181_s9 = sadd.s32 1, %s1255_s28 }
   0x8   : > { %s178_s10 = ssub.s32 %s1259_s29, %s1334_s8  ;;  %p191_p0 = scmp.ne.s32.totalorder %s1255_s28, %s1251_s27 }
   0x9   : > { %p179_p1 = scmp.eq.s32.totalorder %s178_s10, 0  ;;  %p192_p2 = scmp.eq.s32.totalorder %s1330_s6, 1 }
   0xa   : > { %p197_p3 = scmp.ne.s32.totalorder %s1251_s27, %s1247_s26  ;;  %p198_p4 = scmp.eq.s32.totalorder %s1022_s30, 1 }
   0xb   : > { %s1345_s11 = scalar_select %p179_p1, %s1255_s28, %s181_s9  }
   0xc   : > { %p1347_p5 = por %p192_p2, %p191_p0  ;;  %p1351_p6 = por %p198_p4, %p197_p3 }
   0xd   : > { %p1025_p7 = scmp.ge.s32.totalorder %s1259_s29, 1  ;;  %p243_p8 = scmp.lt.s32.totalorder %s1259_s29, 3 }
   0xf   : > { %p244_p9 = pnand %p1025_p7, %p243_p8 }
  0x10   : > { %v285_v1 = vld [vmem:[%s1549_s1 + $0x10] sm:$0xff] (!%p244_p9)  ;;  %v283_v2 = vld [vmem:[%s1549_s1] sm:$0xff] (!%p244_p9)  ;;  %v1261_v3 = vmov (!%p244_p9), 1   ;;  %v284_v4 = vld [vmem:[%s1549_s1 + $0x8] sm:$0xff] (!%p244_p9)  ;;  %v1262_v5 = vmov (!%p244_p9), 0   ;;  %v1263_v17 = vmov (!%p244_p9), 0.0   ;;  %v308_v25 = vlaneseq (!%p244_p9) }
  0x11   : > { %247 = sbr.rel (%p244_p9) target bundleno = 1145 (0x479), region = 48  ;;  %1145 = vset.pattern.permute.xlu0 (!%p244_p9), %v1261_v3  ;;  %1143 = vset.pattern.permute.xlu1 (!%p244_p9), %v1261_v3  ;;  %v286_v6 = vld [vmem:[%s1549_s1 + $0x18] sm:$0xff] (!%p244_p9)  ;;  %v393_v7 = vld [vmem:[%s1550_s2 + $0x8] sm:$0xff] (!%p244_p9)  ;;  %v392_v8 = vld [vmem:[%s1550_s2] sm:$0xff] (!%p244_p9)  ;;  %s1027_s24 = sshll.u32 (!%p244_p9), %s1330_s6, 1  ;;  %vm452_vm0 = vcmask (!%p244_p9), 261120  }
  0x12   : > { %351 = vperm.xlu0 (!%p244_p9), %1145, %v285_v1   ;;  %343 = vperm.xlu1 (!%p244_p9), %1143, %v283_v2   ;;  %v428_v9 = vld [vmem:[%s1552_s4] sm:$0xff] (!%p244_p9)  ;;  %v394_v10 = vld [vmem:[%s1550_s2 + $0x10] sm:$0xff] (!%p244_p9)  ;;  %v395_v12 = vld [vmem:[%s1550_s2 + $0x18] sm:$0xff] (!%p244_p9)  ;;  %p276_p10 = scmp.lt.s32.totalorder (!%p244_p9), %s1027_s24, 3  ;;  %v1421_v26 = vshrl.u32 (!%p244_p9), %v308_v25, 7  ;;  %s1063_s9 = sshll.u32 (!%p244_p9), %s1330_s6, 5 }
  0x13   : > { %v430_v11 = vld [vmem:[%s1552_s4 + $0x10] sm:$0xff] (!%p244_p9)  ;;  %v1037_v13 = vld [vmem:[%s1552_s4 + $0x20] sm:$0xff] (!%p244_p9)  ;;  %v429_v14 = vld [vmem:[%s1552_s4 + $0x8] sm:$0xff] (!%p244_p9)  ;;  %529 = vmatprep.mubr.f32.mxu0 (!%p244_p9), %v1263_v17  ;;  %541 = vmatprep.mubr.f32.mxu1 (!%p244_p9), %v1263_v17  ;;  %vm945_vm1 = vcmp.lt.s32.totalorder (!%p244_p9), %v308_v25, 256  ;;  %s1506_s17 = scalar_lea.hbm (!%p244_p9), %s1555_s7, %s1063_s9  ;;  %s1265_s6 = smov (!%p244_p9), [#allocation3]  }
  0x14   : > { %v1039_v15 = vld [vmem:[%s1552_s4 + $0x30] sm:$0xff] (!%p244_p9)  ;;  %v431_v16 = vld [vmem:[%s1552_s4 + $0x18] sm:$0xff] (!%p244_p9)  ;;  %v1049_v18 = vld [vmem:[%s1552_s4 + $0x40] sm:$0xff] (!%p244_p9)  ;;  %v1427_v29 = vsub.s32 (!%p244_p9), 0, %v1421_v26  ;;  %v314_v30 = vsub.s32 (!%p244_p9), 2, %v1421_v26  ;;  %v360_v31 = vsub.s32 (!%p244_p9), 1, %v1421_v26 }
  0x15   : > { %v1038_v19 = vld [vmem:[%s1552_s4 + $0x28] sm:$0xff] (!%p244_p9)  ;;  %v1051_v20 = vld [vmem:[%s1552_s4 + $0x50] sm:$0xff] (!%p244_p9)  ;;  %v1040_v21 = vld [vmem:[%s1552_s4 + $0x38] sm:$0xff] (!%p244_p9)  ;;  %v364_v32 = vsub.s32 (!%p244_p9), 3, %v1421_v26  ;;  %s1201_s20 = sshll.u32 (!%p244_p9), %s1265_s6, 4  ;;  %s1202_s20 = int_to_ptr.vmem [resolvable:$false] %s1201_s20 }
  0x16   : > { %1146 = vset.pattern.permute.xlu0 (!%p244_p9), %v1262_v5  ;;  %347 = vperm.xlu1 (!%p244_p9), %1143, %v284_v4   ;;  %v841_v22 = vld [vmem:[#allocation2] sm:$0x1] (!%p244_p9)  ;;  %v1050_v23 = vld [vmem:[%s1552_s4 + $0x48] sm:$0xff] (!%p244_p9)  ;;  %v1052_v24 = vld [vmem:[%s1552_s4 + $0x58] sm:$0xff] (!%p244_p9)  ;;  %s1203_s21 = scalar_lea.vmem (!%p244_p9), %s1202_s20, 64 }
  0x17   : > { %289 = vperm.xlu0 (!%p244_p9), %1146, %v283_v2  }
  0x18   : > { %s1563_s24 = smov (!%p276_p10, %s1027_s24), 3 }
  0x19   : > { %s1028_s25 = sshll.u32 %s1563_s24, 1 }
  0x1a   : > { %1144 = vset.pattern.permute.xlu1 %v1262_v5  ;;  %s279_s10 = scalar_lea.vmem %s1548_s0, %s1028_s25  ;;  %s272_s25 = sand.u32 1, %s1251_s27  }
  0x1b   : > { %294 = vperm.xlu0 %1146, %v284_v4   ;;  %304 = vperm.xlu1 %1144, %v286_v6   ;;  %v282_v34 = vld [vmem:[%s279_s10] sm:$0xf]  ;;  %s1026_s30 = sshll.u32 %s272_s25, 1  ;;  %s949_s18 = scalar_lea.sflag [#allocation4], %s272_s25 }
  0x1c   : > { %v311_v36 = vrot.slane %v282_v34, %v1427_v29  ;;  %v315_v37 = vrot.slane %v282_v34, %v314_v30  ;;  %v361_v38 = vrot.slane %v282_v34, %v360_v31  ;;  %v365_v39 = vrot.slane %v282_v34, %v364_v32  ;;  %v425_v30 = vld [vmem:[%s1551_s3 + $0x8] sm:$0xff]  ;;  %s274_s10 = scalar_lea.vmem [#allocation3], %s1026_s30 }
  0x1d   : > { %s963_s14 = sshll.u32 %s274_s10, 4  ;;  %s1508_s14 = int_to_ptr.vmem [resolvable:$true] %s963_s14 }
  0x1e   : > { %v321_v42 = vrot.slane %v311_v36, %v1427_v29  ;;  %v325_v43 = vrot.slane %v315_v37, %v1427_v29  ;;  %v371_v44 = vrot.slane %v361_v38, %v360_v31  ;;  %v375_v45 = vrot.slane %v365_v39, %v360_v31  ;;  %v427_v31 = vld [vmem:[%s1551_s3 + $0x18] sm:$0xff]  ;;  %s1197_s19 = scalar_lea.vmem %s1508_s14, 32  ;;  %p1204_p0 = scmp.lt.s32.totalorder %s1508_s14, %s1202_s20 }
  0x1f   : > { %299 = vperm.xlu0 %1146, %v285_v1   ;;  %1147 = vset.pattern.permute.xlu1 %v1261_v3  ;;  %p1198_p11 = scmp.ne.s32.totalorder %s1508_s14, %s1197_s19  ;;  %p1205_p1 = scmp.lt.s32.totalorder %s1203_s21, %s1197_s19 }
  0x20   : > { %355 = vperm.xlu1 %1147, %v286_v6  }
  0x21   : > { %p1199_p12 = pnand %p1198_p11, %p1347_p5  ;;  %p1206_p2 = por %p1205_p1, %p1204_p0 }
  0x23   : > { %403 = vperm.xlu0 %1146, %v393_v7   ;;  %p1200_p13 = pneg %p1199_p12 }
  0x24   : > { %1148 = vset.pattern.permute.xlu1 %v1262_v5 }
  0x25   : > { %398 = vperm.xlu1 %1148, %v392_v8   ;;  %p1207_p3 = pnand %p1206_p2, %p1200_p13 }
  0x27   : > { %434 = vperm.xlu0 %1146, %v428_v9  }
  0x29   : > { %408 = vperm.xlu1 %1148, %v394_v10  }
  0x2b   : > { %444 = vperm.xlu0 %1146, %v430_v11  }
  0x2d   : > { %413 = vperm.xlu1 %1148, %v395_v12  }
  0x2f   : > { %574 = vperm.xlu0 %1146, %v1037_v13  }
  0x31   : > { %439 = vperm.xlu1 %1148, %v429_v14  }
  0x33   : > { %584 = vperm.xlu0 %1146, %v1039_v15  }
  0x35   : > { %449 = vperm.xlu1 %1148, %v431_v16  }
  0x37   : > { %713 = vperm.xlu0 %1146, %v1049_v18  }
  0x39   : > { %579 = vperm.xlu1 %1148, %v1038_v19  }
  0x3b   : > { %723 = vperm.xlu0 %1146, %v1051_v20  }
  0x3d   : > { %589 = vperm.xlu1 %1148, %v1040_v21  }
  0x3f   : > { %844 = vperm.xlu0 %1146, %v841_v22  }
  0x41   : > { %718 = vperm.xlu1 %1148, %v1050_v23  }
  0x45   : > { %728 = vperm.xlu1 %1148, %v1052_v24  }
  0x91   : > { %v344_v27 = vpop.permute.xlu1 %343  ;;  %v352_v28 = vpop.permute.xlu0 %351 }
  0x92   : > { %v376_v52 = vmul.f32 %v371_v44, %v344_v27  ;;  %v377_v53 = vmul.f32 %v375_v45, %v344_v27  ;;  %v380_v8 = vmul.f32 %v371_v44, %v352_v28  ;;  %v381_v10 = vmul.f32 %v375_v45, %v352_v28  ;;  %v424_v27 = vld [vmem:[%s1551_s3] sm:$0xff]  ;;  %v426_v28 = vld [vmem:[%s1551_s3 + $0x10] sm:$0xff] }
  0x95   : > { %v348_v33 = vpop.permute.xlu1 %347 }
  0x96   : > { %v290_v35 = vpop.permute.xlu0 %289  ;;  %v378_v54 = vmul.f32 %v371_v44, %v348_v33  ;;  %v379_v55 = vmul.f32 %v375_v45, %v348_v33 }
  0x97   : > { %v326_v47 = vmul.f32 %v321_v42, %v290_v35  ;;  %v327_v48 = vmul.f32 %v325_v43, %v290_v35 }
  0x99   : > { %v384_v59 = vadd.f32 %v376_v52, %v326_v47  ;;  %v385_v60 = vadd.f32 %v377_v53, %v327_v48 }
  0x9a   : > { %v295_v40 = vpop.permute.xlu0 %294  ;;  %v305_v41 = vpop.permute.xlu1 %304 }
  0x9b   : > { %v328_v49 = vmul.f32 %v321_v42, %v295_v40  ;;  %v329_v50 = vmul.f32 %v325_v43, %v295_v40  ;;  %v332_v11 = vmul.f32 %v321_v42, %v305_v41  ;;  %v333_v12 = vmul.f32 %v325_v43, %v305_v41 }
  0x9d   : > { %v386_v57 = vadd.f32 %v378_v54, %v328_v49  ;;  %v387_v58 = vadd.f32 %v379_v55, %v329_v50 }
  0x9e   : > { %v300_v46 = vpop.permute.xlu0 %299 }
  0x9f   : > { %v356_v51 = vpop.permute.xlu1 %355  ;;  %v330_v2 = vmul.f32 %v321_v42, %v300_v46  ;;  %v331_v3 = vmul.f32 %v325_v43, %v300_v46 }
  0xa0   : > { %v382_v4 = vmul.f32 %v371_v44, %v356_v51  ;;  %v383_v5 = vmul.f32 %v375_v45, %v356_v51 }
  0xa1   : > { %v388_v13 = vadd.f32 %v380_v8, %v330_v2  ;;  %v389_v14 = vadd.f32 %v381_v10, %v331_v3  ;;  %v1035_v2 = vld [vmem:[%s1551_s3 + $0x30] sm:$0xff]  ;;  %v1036_v3 = vld [vmem:[%s1551_s3 + $0x38] sm:$0xff] }
  0xa2   : > { %v404_v56 = vpop.permute.xlu0 %403  ;;  %v390_v15 = vadd.f32 %v382_v4, %v332_v11  ;;  %v391_v16 = vadd.f32 %v383_v5, %v333_v12 }
  0xa3   : > { %v418_v62 = vadd.f32 %v404_v56, %v386_v57  ;;  %v419_v63 = vadd.f32 %v404_v56, %v387_v58 }
  0xa4   : > { %v399_v61 = vpop.permute.xlu1 %398 }
  0xa5   : > { %v416_v0 = vadd.f32 %v399_v61, %v384_v59  ;;  %v417_v1 = vadd.f32 %v399_v61, %v385_v60 }
  0xa6   : > { %v435_v32 = vpop.permute.xlu0 %434 }
  0xa7   : > { %v1064_v6 = vpack.c.bf16 %v419_v63, %v417_v1  ;;  %v1066_v7 = vpack.c.bf16 %v418_v62, %v416_v0  ;;  %v1033_v0 = vld [vmem:[%s1551_s3 + $0x20] sm:$0xff]  ;;  %v1034_v1 = vld [vmem:[%s1551_s3 + $0x28] sm:$0xff] }
  0xa8   : > { %v409_v9 = vpop.permute.xlu1 %408 }
  0xa9   : > { %1065 = vmatprep.subr.bf16.mxu0 %v1064_v6  ;;  %1096 = vmatprep.subr.bf16.mxu1 %v1064_v6  ;;  %v420_v19 = vadd.f32 %v409_v9, %v388_v13  ;;  %v421_v20 = vadd.f32 %v409_v9, %v389_v14 }
  0xaa   : > { %1067 = vmatpush1.bf16.msra.mxu0 %v1066_v7  ;;  %1098 = vmatpush1.bf16.msra.mxu1 %v1066_v7  ;;  %v445_v34 = vpop.permute.xlu0 %444 }
  0xac   : > { %v414_v18 = vpop.permute.xlu1 %413 }
  0xad   : > { %v422_v21 = vadd.f32 %v414_v18, %v390_v15  ;;  %v423_v22 = vadd.f32 %v414_v18, %v391_v16 }
  0xae   : > { %v575_v4 = vpop.permute.xlu0 %574 }
  0xaf   : > { %v1068_v23 = vpack.c.bf16 %v423_v22, %v421_v20  ;;  %v1070_v24 = vpack.c.bf16 %v422_v21, %v420_v19 }
  0xb0   : > { %v440_v33 = vpop.permute.xlu1 %439 }
  0xb1   : > { %1069 = vmatprep.subr.bf16.mxu0 %v1068_v23  ;;  %1097 = vmatprep.subr.bf16.mxu1 %v1068_v23 }
  0xb2   : > { %1071 = vmatpush1.bf16.msra.mxu0 %v1070_v24  ;;  %1099 = vmatpush1.bf16.msra.mxu1 %v1070_v24  ;;  %v585_v14 = vpop.permute.xlu0 %584 }
  0xb4   : > { %v450_v43 = vpop.permute.xlu1 %449 }
  0xb5   : > { %1029 = vmatmul.mubr.msk.f32.vlgmr.msra.gmra.mrb[0].mxu0 %vm452_vm0, %v424_v27  ;;  %1031 = vmatmul.mubr.msk.f32.vlgmr.msra.gmra.mrb[0].mxu1 %vm452_vm0, %v426_v28 }
  0xb6   : > { %535 = vmatprep.mubr.f32.mxu0 %v1263_v17  ;;  %547 = vmatprep.mubr.f32.mxu1 %v1263_v17 }
  0xb8   : > { %v580_v9 = vpop.permute.xlu1 %579 }
  0xb9   : > { %1030 = vmatmul.mubr.msk.f32.gmra.mrb[2].mxu0 %vm452_vm0, %v425_v30  ;;  %1032 = vmatmul.mubr.msk.f32.gmra.mrb[2].mxu1 %vm452_vm0, %v427_v31 }
  0xba   : > { %668 = vmatprep.mubr.f32.mxu1 %v1263_v17  ;;  %807 = vmatprep.mubr.f32.mxu0 %v1263_v17 }
  0xbc   : > { %v590_v20 = vpop.permute.xlu1 %589 }
 0x188   : > { %v531_v35 = vpop.f32.mrb[0].mxu0  ;;  %v543_v36 = vpop.f32.mrb[0].mxu1 }
 0x189   : > { %v532_v37 = vadd.f32 %v531_v35, %v435_v32  ;;  %v544_v38 = vadd.f32 %v543_v36, %v445_v34  ;;  %v533_v39 = vpop.f32.mrb[1].mxu0  ;;  %v545_v40 = vpop.f32.mrb[1].mxu1 }
 0x18a   : > { %v534_v41 = vadd.f32 %v533_v39, %v435_v32  ;;  %v546_v42 = vadd.f32 %v545_v40, %v445_v34  ;;  %v1045_v40 = vld [vmem:[%s1551_s3 + $0x40] sm:$0xff] }
 0x18b   : > { %1149 = vtanh.f32 %v532_v37 }
 0x18c   : > { %1151 = vtanh.f32 %v544_v38  ;;  %v537_v44 = vpop.f32.mrb[2].mxu0  ;;  %v549_v45 = vpop.f32.mrb[2].mxu1 }
 0x18d   : > { %1153 = vtanh.f32 %v534_v41  ;;  %v538_v46 = vadd.f32 %v537_v44, %v440_v33  ;;  %v550_v47 = vadd.f32 %v549_v45, %v450_v43  ;;  %v539_v48 = vpop.f32.mrb[3].mxu0  ;;  %v551_v49 = vpop.f32.mrb[3].mxu1  ;;  %v1046_v41 = vld [vmem:[%s1551_s3 + $0x48] sm:$0xff] }
 0x18e   : > { %1155 = vtanh.f32 %v546_v42  ;;  %v540_v50 = vadd.f32 %v539_v48, %v440_v33  ;;  %v552_v51 = vadd.f32 %v551_v49, %v450_v43  ;;  %v1047_v42 = vld [vmem:[%s1551_s3 + $0x50] sm:$0xff]  ;;  %v1048_v43 = vld [vmem:[%s1551_s3 + $0x58] sm:$0xff]  ;;  %v714_v44 = vpop.permute.xlu0 %713  ;;  %v719_v49 = vpop.permute.xlu1 %718 }
 0x18f   : > { %1157 = vtanh.f32 %v538_v46 }
 0x190   : > { %1159 = vtanh.f32 %v550_v47 }
 0x191   : > { %1161 = vtanh.f32 %v540_v50 }
 0x192   : > { %1163 = vtanh.f32 %v552_v51 }
 0x195   : > { %v1150_v52 = vpop.eup %1149 }
 0x196   : > { %v1152_v53 = vpop.eup %1151 }
 0x197   : > { %v1154_v54 = vpop.eup %1153 }
 0x198   : > { %v1156_v55 = vpop.eup %1155 }
 0x199   : > { %v1158_v56 = vpop.eup %1157 }
 0x19a   : > { %v1160_v57 = vpop.eup %1159  ;;  %v1074_v58 = vpack.c.bf16 %v1158_v56, %v1150_v52 }
 0x19b   : > { %v1162_v59 = vpop.eup %1161  ;;  %v1078_v60 = vpack.c.bf16 %v1160_v57, %v1152_v53 }
 0x19c   : > { %v1164_v61 = vpop.eup %1163  ;;  %v1072_v62 = vpack.c.bf16 %v1162_v59, %v1154_v54 }
 0x19d   : > { %v1076_v63 = vpack.c.bf16 %v1164_v61, %v1156_v55 }
 0x19e   : > { %1073 = vmatprep.subr.bf16.mxu1 %v1072_v62 }
 0x19f   : > { %1075 = vmatpush1.bf16.msra.mxu1 %v1074_v58  ;;  %v729_v58 = vpop.permute.xlu1 %728 }
 0x1a0   : > { %1077 = vmatprep.subr.bf16.mxu1 %v1076_v63 }
 0x1a3   : > { %1079 = vmatpush1.bf16.msra.mxu1 %v1078_v60 }
 0x1a6   : > { %1041 = vmatmul.mubr.msk.f32.vlgmr.msra.gmra.mrb[4].mxu1 %vm452_vm0, %v1033_v0 }
 0x1a7   : > { %674 = vmatprep.mubr.f32.mxu1 %v1263_v17 }
 0x1aa   : > { %1042 = vmatmul.mubr.msk.f32.gmra.mrb[6].mxu1 %vm452_vm0, %v1034_v1 }
 0x1ab   : > { %680 = vmatprep.mubr.f32.mxu1 %v1263_v17 }
 0x1ae   : > { %1043 = vmatmul.mubr.msk.f32.gmra.mrb[8].mxu1 %vm452_vm0, %v1035_v2 }
 0x1af   : > { %686 = vmatprep.mubr.f32.mxu1 %v1263_v17 }
 0x1b2   : > { %1044 = vmatmul.mubr.msk.f32.gmra.mrb[10].mxu1 %vm452_vm0, %v1036_v3 }
 0x1b3   : > { %918 = vmatprep.mubr.f32.mxu1 %v1263_v17 }
 0x279   : > { %v670_v5 = vpop.f32.mrb[4].mxu1 }
 0x27a   : > { %v671_v6 = vadd.f32 %v670_v5, %v575_v4  ;;  %v672_v7 = vpop.f32.mrb[5].mxu1 }
 0x27b   : > { %v673_v8 = vadd.f32 %v672_v7, %v575_v4 }
 0x27c   : > { %1165 = vtanh.f32 %v671_v6 }
 0x27d   : > { %v676_v10 = vpop.f32.mrb[6].mxu1  ;;  %1167 = vtanh.f32 %v673_v8 }
 0x27e   : > { %v677_v11 = vadd.f32 %v676_v10, %v580_v9  ;;  %v678_v12 = vpop.f32.mrb[7].mxu1 }
 0x27f   : > { %v679_v13 = vadd.f32 %v678_v12, %v580_v9  ;;  %v1264_v12 = vmov 1966171168  }
 0x280   : > { %1169 = vtanh.f32 %v677_v11  ;;  %v840_v11 = vld [vmem:[%s1553_s5] sm:$0x1] }
 0x281   : > { %1171 = vtanh.f32 %v679_v13  ;;  %v682_v15 = vpop.f32.mrb[8].mxu1  ;;  %v929_v13 = vunpack.c.l.s4 %v1264_v12 }
 0x282   : > { %v683_v16 = vadd.f32 %v682_v15, %v585_v14  ;;  %v684_v18 = vpop.f32.mrb[9].mxu1 }
 0x283   : > { %v685_v19 = vadd.f32 %v684_v18, %v585_v14  ;;  %v930_v15 = vunpack.c.0.s8 %v929_v13 }
 0x284   : > { %1173 = vtanh.f32 %v683_v16 }
 0x285   : > { %v688_v21 = vpop.f32.mrb[10].mxu1  ;;  %1175 = vtanh.f32 %v685_v19 }
 0x286   : > { %v689_v22 = vadd.f32 %v688_v21, %v590_v20  ;;  %v690_v23 = vpop.f32.mrb[11].mxu1  ;;  %v1166_v27 = vpop.eup %1165 }
 0x287   : > { %v691_v24 = vadd.f32 %v690_v23, %v590_v20  ;;  %v1168_v28 = vpop.eup %1167 }
 0x288   : > { %1177 = vtanh.f32 %v689_v22  ;;  %v933_v22 = vsub.s32 %v930_v15, %v1421_v26 }
 0x289   : > { %1179 = vtanh.f32 %v691_v24 }
 0x28a   : > { %v1170_v30 = vpop.eup %1169 }
 0x28b   : > { %v1172_v31 = vpop.eup %1171  ;;  %v1082_v32 = vpack.c.bf16 %v1170_v30, %v1166_v27 }
 0x28c   : > { %v1080_v33 = vpack.c.bf16 %v1172_v31, %v1168_v28 }
 0x28e   : > { %1081 = vmatprep.subr.bf16.mxu0 %v1080_v33  ;;  %v1174_v34 = vpop.eup %1173 }
 0x28f   : > { %1083 = vmatpush1.bf16.msra.mxu0 %v1082_v32  ;;  %v1176_v35 = vpop.eup %1175 }
 0x292   : > { %v1178_v36 = vpop.eup %1177 }
 0x293   : > { %v1180_v37 = vpop.eup %1179  ;;  %v1086_v38 = vpack.c.bf16 %v1178_v36, %v1174_v34 }
 0x294   : > { %v1084_v39 = vpack.c.bf16 %v1180_v37, %v1176_v35 }
 0x296   : > { %1085 = vmatprep.subr.bf16.mxu0 %v1084_v39 }
 0x297   : > { %1087 = vmatpush1.bf16.msra.mxu0 %v1086_v38 }
 0x29a   : > { %1053 = vmatmul.mubr.msk.f32.vlgmr.msra.gmra.mrb[4].mxu0 %vm452_vm0, %v1045_v40 }
 0x29b   : > { %813 = vmatprep.mubr.f32.mxu0 %v1263_v17 }
 0x29e   : > { %1054 = vmatmul.mubr.msk.f32.gmra.mrb[6].mxu0 %vm452_vm0, %v1046_v41 }
 0x29f   : > { %819 = vmatprep.mubr.f32.mxu0 %v1263_v17 }
 0x2a2   : > { %1055 = vmatmul.mubr.msk.f32.gmra.mrb[8].mxu0 %vm452_vm0, %v1047_v42 }
 0x2a3   : > { %825 = vmatprep.mubr.f32.mxu0 %v1263_v17  ;;  %v724_v17 = vpop.permute.xlu0 %723 }
 0x2a6   : > { %1056 = vmatmul.mubr.msk.f32.gmra.mrb[10].mxu0 %vm452_vm0, %v1048_v43 }
 0x2a7   : > { %v845_v14 = vpop.permute.xlu0 %844 }
 0x2a8   : > { %v850_v16 = vrot.slane %v845_v14, %v1427_v29 }
 0x36d   : > { %v809_v45 = vpop.f32.mrb[4].mxu0 }
 0x36e   : > { %v810_v46 = vadd.f32 %v809_v45, %v714_v44  ;;  %v811_v47 = vpop.f32.mrb[5].mxu0 }
 0x36f   : > { %v812_v48 = vadd.f32 %v811_v47, %v714_v44 }
 0x370   : > { %1181 = vtanh.f32 %v810_v46 }
 0x371   : > { %v815_v50 = vpop.f32.mrb[6].mxu0  ;;  %1183 = vtanh.f32 %v812_v48 }
 0x372   : > { %v816_v51 = vadd.f32 %v815_v50, %v719_v49  ;;  %v817_v52 = vpop.f32.mrb[7].mxu0 }
 0x373   : > { %v818_v53 = vadd.f32 %v817_v52, %v719_v49 }
 0x374   : > { %1185 = vtanh.f32 %v816_v51 }
 0x375   : > { %1187 = vtanh.f32 %v818_v53  ;;  %v821_v54 = vpop.f32.mrb[8].mxu0 }
 0x376   : > { %v822_v55 = vadd.f32 %v821_v54, %v724_v17  ;;  %v823_v56 = vpop.f32.mrb[9].mxu0 }
 0x377   : > { %v824_v57 = vadd.f32 %v823_v56, %v724_v17 }
 0x378   : > { %1189 = vtanh.f32 %v822_v55 }
 0x379   : > { %v827_v59 = vpop.f32.mrb[10].mxu0  ;;  %1191 = vtanh.f32 %v824_v57 }
 0x37a   : > { %v828_v60 = vadd.f32 %v827_v59, %v729_v58  ;;  %v829_v61 = vpop.f32.mrb[11].mxu0  ;;  %v1182_v63 = vpop.eup %1181 }
 0x37b   : > { %v830_v62 = vadd.f32 %v829_v61, %v729_v58  ;;  %v1184_v0 = vpop.eup %1183 }
 0x37c   : > { %1193 = vtanh.f32 %v828_v60 }
 0x37d   : > { %1195 = vtanh.f32 %v830_v62 }
 0x37e   : > { %v1186_v1 = vpop.eup %1185 }
 0x37f   : > { %v1188_v2 = vpop.eup %1187  ;;  %v1090_v3 = vpack.c.bf16 %v1186_v1, %v1182_v63 }
 0x380   : > { %v1088_v4 = vpack.c.bf16 %v1188_v2, %v1184_v0 }
 0x382   : > { %1089 = vmatprep.subr.bf16.mxu1 %v1088_v4  ;;  %v1190_v5 = vpop.eup %1189 }
 0x383   : > { %1091 = vmatpush1.bf16.msra.mxu1 %v1090_v3  ;;  %v1192_v6 = vpop.eup %1191 }
 0x386   : > { %v1194_v7 = vpop.eup %1193 }
 0x387   : > { %v1196_v8 = vpop.eup %1195  ;;  %v1094_v9 = vpack.c.bf16 %v1194_v7, %v1190_v5 }
 0x388   : > { %v1092_v10 = vpack.c.bf16 %v1196_v8, %v1192_v6 }
 0x38a   : > { %1093 = vmatprep.subr.bf16.mxu1 %v1092_v10 }
 0x38b   : > { %1095 = vmatpush1.bf16.msra.mxu1 %v1094_v9 }
 0x38e   : > { %1057 = vmatmul.mubr.msk.f32.vlgmr.msra.gmra.mrb[12].mxu1 %vm452_vm0, %v840_v11 }
 0x461   : > { %v920_v18 = vpop.f32.mrb[12].mxu1 }
 0x462   : > { %v921_v19 = vadd.f32 %v920_v18, %v850_v16  ;;  %v922_v20 = vpop.f32.mrb[13].mxu1 }
 0x463   : > { %v923_v21 = vadd.f32 %v922_v20, %v850_v16 }
 0x465   : > { %v927_v23 = vcombine.low %v921_v19, %v923_v21 }
 0x467   : > { %v934_v24 = vrot.slane %v927_v23, %v933_v22 }
 0x469   : > { %v941_v27 = vrot.slane %v934_v24, %v933_v22 }
 0x46b   : > { %947 = vst.msk [vmem:[%s274_s10] sm:$0x3] %vm945_vm1, %v941_v27 }
 0x46c   : > { %1210 = shalt.err (!%p1207_p3)
}
 0x46d   : > { %s1211_s22 = scalar_lea.hbm %s1506_s17, 32  ;;  %s1215_s25 = scalar_lea.hbm %s1555_s7, 64 }
 0x46e   : > { %p1212_p4 = scmp.ne.s32.totalorder %s1506_s17, %s1211_s22  ;;  %p1216_p9 = scmp.lt.u32.totalorder %s1506_s17, %s1555_s7 }
 0x46f   : > { %p1217_p10 = scmp.lt.u32.totalorder %s1215_s25, %s1211_s22  ;;  %p1219_p12 = scmp.lt.u32.totalorder %s1211_s22, %s1506_s17 }
 0x470   : > { %p1213_p7 = pnand %p1212_p4, %p1347_p5 }
 0x471   : > { %p1218_p11 = por %p1217_p10, %p1216_p9 }
 0x472   : > { %p1214_p8 = pneg %p1213_p7 }
 0x473   : > { %p1220_p13 = por %p1219_p12, %p1218_p11 }
 0x475   : > { %p1221_p0 = pnand %p1220_p13, %p1214_p8 }
 0x477   : > { %1224 = shalt.err (!%p1221_p0)
}
 0x478   : > { %1100 = dma.vmem_to_hbm [thread:$0]  (%p1347_p5), %s1508_s14, 32, %s1506_s17, %s949_s18  }
 0x479 PF: > { %p1106_p1 = scmp.ge.s32.totalorder %s1259_s29, 2  ;;  %s975_s10 = sand.u32 1, %s1247_s26  }
 0x47a   : > { %s976_s15 = scalar_lea.sflag [#allocation4], %s975_s10 }
 0x47b   : > { %p1103_p2 = pnand %p1106_p1, %p1351_p6 }
 0x47d   : > { %1242 = dma.done.wait (!%p1103_p2), %s976_s15, 32  }
 0x47e   : > { %1244 = vsyncadd (!%p1103_p2), %s976_s15, 4294967264  ;;  %p19_p3 = scmp.ge.s32.totalorder %s1334_s8, 4   ;;  %s1558_s26 = smov %s1251_s27 }
 0x47f   : > { %s1559_s27 = smov %s1255_s28  ;;  %s1560_s28 = smov %s1345_s11 }
 0x480   : > { %s1561_s29 = smov %s1334_s8  ;;  %21 = sbr.rel (!%p19_p3) target bundleno = 6 (0x6), region = 87 }
 0x487   :  { %981 = vsyncpa [#allocation4], 1 }
 0x488   :  { %983 = vsyncpa [#allocation4 + $0x1], 1 }

</bundles_post_ra>
